<compile_context>
chip_gen: v5e
topology: v5e:2x2
jax: 0.10.0
libtpu: 0.0.40
codegen_flags: <defaults>
</compile_context>

<pallas_src>
import functools

import jax
import jax.numpy as jnp
from jax.experimental import pallas as pl
from jax.experimental.pallas import tpu as pltpu


# ----------------------------------------------------------------------------
# Pallas kernel: one (C, tm) pixel-column tile through the whole 1x1-conv stack
# ----------------------------------------------------------------------------
def fcomb_kernel(*refs, n_mid):
    # Transposed (channels-on-sublanes, pixels-on-lanes) formulation:
    #   h = relu(W1f_T @ x + zb)          zb = (z @ W1z + b1) per batch, (F, 1)
    #   h = relu(Wk_T @ h + bk)           for each middle layer
    #   y = Wlast_T @ h + blast           (no ReLU)
    if n_mid > 0:
        (fm_ref, zb_ref, w1t_ref, wmid_ref, bmid_ref,
         wlast_ref, blast_ref, out_ref) = refs
    else:
        fm_ref, zb_ref, w1t_ref, wlast_ref, blast_ref, out_ref = refs
        wmid_ref = bmid_ref = None

    cdt = w1t_ref.dtype                                    # compute dtype (bf16)
    x = fm_ref[0].astype(cdt)                              # (C, tm)
    h = jnp.dot(w1t_ref[...], x, preferred_element_type=jnp.float32)   # (F, tm) f32

    # z (tiled over HxW + channel concat in the reference) folded into a
    # per-batch, per-output-channel bias column, broadcast over the pixel lanes.
    h = jnp.maximum(h + zb_ref[0], 0.0)                    # (F, tm) f32

    for k in range(n_mid):                                 # static unroll
        wk = wmid_ref[k]                                   # (F, F), pre-transposed
        h = jnp.dot(wk, h.astype(cdt),
                    preferred_element_type=jnp.float32) + bmid_ref[k]
        h = jnp.maximum(h, 0.0)

    out = jnp.dot(wlast_ref[...], h.astype(cdt),
                  preferred_element_type=jnp.float32) + blast_ref[...]
    out_ref[0] = out.astype(out_ref.dtype)                 # (num_classes, tm), no ReLU


# ----------------------------------------------------------------------------
# Wrapper helpers
# ----------------------------------------------------------------------------
def _round_up(x, m):
    return ((x + m - 1) // m) * m


def _pick_pixel_tile(hw, batch, target=2048, min_steps=8):
    """Pixel-tile (lane axis) size: a multiple of 128 (lane-dense stores), fat
    enough for long MXU N-runs, shrunk only until batch * n_tiles >= min_steps
    (enough grid steps for double-buffering on both v7x TensorCores)."""
    tm = min(target, _round_up(hw, 128))
    tm = _round_up(tm, 128)
    while tm > 128 and batch * pl.cdiv(hw, tm) < min_steps:
        tm = max(128, _round_up(tm // 2, 128))
    return max(tm, 128)


def _vmem_limit_bytes(frac=0.8, fallback=64 << 20):
    # 80% of per-core VMEM: ~51 MiB on v7x (64 MiB physical, leaves headroom for
    # compiler scratch), ~102 MiB on v5e/v6e (128 MiB) so big tiles aren't blocked.
    cap = fallback
    try:
        cap = int(pltpu.get_tpu_info().vmem_capacity_bytes)
    except Exception:
        pass
    return int(frac * cap)


# ----------------------------------------------------------------------------
# Wrapper
# ----------------------------------------------------------------------------
def fcomb_forward(feature_map, z, params, num_classes, compute_dtype=jnp.bfloat16):
    """Fcomb.forward. feature_map: (B, C, H, W) NCHW, z: (B, L) -> (B, num_classes, H, W)."""
    B, C, H, W = feature_map.shape
    F = params["w1f"].shape[1]
    n_mid = int(params["n_mid"])
    HW = H * W

    # NCHW-native: merge spatial dims only (free reshape, no transpose / no cast);
    # channels -> sublanes, pixels -> lanes.  Dtype cast happens in-kernel.
    fm = feature_map.reshape(B, C, HW)

    # z is constant over HxW, so its path through the first 1x1 conv collapses to
    # a per-batch bias column: zb = z @ W1[C:, :] + b1  -> (B, F, 1).
    zb = (z.astype(jnp.float32) @ params["w1z"].astype(jnp.float32)
          + params["b1"].astype(jnp.float32)).reshape(B, F, 1)

    # Pre-transposed (output-channel-major) weights so every layer is W_T @ h.
    w1t = params["w1f"].T.astype(compute_dtype)                       # (F, C)
    wlast_t = params["w_last"].T.astype(compute_dtype)                # (NC, F)
    blast = params["b_last"].reshape(num_classes, 1).astype(jnp.float32)

    tm = _pick_pixel_tile(HW, B)
    hw_pad = _round_up(HW, tm)
    if hw_pad != HW:  # robust to H*W with no nice divisor (e.g. 14*14, 50*50)
        fm = jnp.pad(fm, ((0, 0), (0, 0), (0, hw_pad - HW)))
    grid = (B, hw_pad // tm)

    in_arrays = [fm, zb, w1t]
    in_specs = [
        pl.BlockSpec((1, C, tm), lambda b, t: (b, 0, t)),
        pl.BlockSpec((1, F, 1), lambda b, t: (b, 0, 0)),
        pl.BlockSpec((F, C), lambda b, t: (0, 0)),
    ]
    if n_mid > 0:
        wmid_t = jnp.transpose(params["w_mid"], (0, 2, 1)).astype(compute_dtype)
        bmid = jnp.transpose(params["b_mid"], (0, 2, 1)).astype(jnp.float32)
        in_arrays += [wmid_t, bmid]
        in_specs += [
            pl.BlockSpec((n_mid, F, F), lambda b, t: (0, 0, 0)),
            pl.BlockSpec((n_mid, F, 1), lambda b, t: (0, 0, 0)),
        ]
    in_arrays += [wlast_t, blast]
    in_specs += [
        pl.BlockSpec((num_classes, F), lambda b, t: (0, 0)),
        pl.BlockSpec((num_classes, 1), lambda b, t: (0, 0)),
    ]

    out = pl.pallas_call(
        functools.partial(fcomb_kernel, n_mid=n_mid),
        out_shape=jax.ShapeDtypeStruct((B, num_classes, hw_pad), jnp.float32),
        grid_spec=pltpu.PrefetchScalarGridSpec(
            num_scalar_prefetch=0,
            grid=grid,
            in_specs=in_specs,
            out_specs=pl.BlockSpec((1, num_classes, tm), lambda b, t: (b, 0, t)),
        ),
        compiler_params=pltpu.CompilerParams(
            dimension_semantics=("parallel", "parallel"),
            vmem_limit_bytes=_vmem_limit_bytes(),
        ),
    )(*in_arrays)

    if hw_pad != HW:
        out = out[:, :, :HW]
    return out.reshape(B, num_classes, H, W)    # already NCHW; free reshape


# ----------------------------------------------------------------------------
# Parameters (he-normal weights, small-normal biases; deterministic)
# ----------------------------------------------------------------------------
# TODO(synk): init_weights / init_weights_orthogonal_normal are not defined in the
# reference snippet; he-normal init is used here (forward math is unaffected).
def make_fcomb_params(key, num_filters, latent_dim, num_classes, no_convs_fcomb):
    F0 = num_filters[0]
    # Matches the PyTorch module: first conv + ReLU, (no_convs_fcomb-2) mid convs
    # (empty range if <= 2), then the last conv -- for any no_convs_fcomb >= 1.
    n_mid = max(no_convs_fcomb - 2, 0)

    key, k1, k1b = jax.random.split(key, 3)
    std1 = (2.0 / (F0 + latent_dim)) ** 0.5
    w1 = jax.random.normal(k1, (F0 + latent_dim, F0), jnp.float32) * std1
    b1 = jax.random.normal(k1b, (1, F0), jnp.float32) * 0.001

    w_mid, b_mid = [], []
    for _ in range(n_mid):
        key, kw, kb = jax.random.split(key, 3)
        w_mid.append(jax.random.normal(kw, (F0, F0), jnp.float32) * (2.0 / F0) ** 0.5)
        b_mid.append(jax.random.normal(kb, (1, F0), jnp.float32) * 0.001)
    if n_mid == 0:  # dummy stacked block (never passed to the kernel)
        w_mid = [jnp.zeros((F0, F0), jnp.float32)]
        b_mid = [jnp.zeros((1, F0), jnp.float32)]

    key, kl, klb = jax.random.split(key, 3)
    w_last = jax.random.normal(kl, (F0, num_classes), jnp.float32) * (2.0 / F0) ** 0.5
    b_last = jax.random.normal(klb, (1, num_classes), jnp.float32) * 0.001

    return {
        "w1f": w1[:F0], "w1z": w1[F0:], "b1": b1,
        "w_mid": jnp.stack(w_mid), "b_mid": jnp.stack(b_mid),
        "w_last": w_last, "b_last": b_last,
        "n_mid": n_mid,
    }, key


# ----------------------------------------------------------------------------
# Pure-JAX f32 reference of the module's forward (tile z, concat, 1x1 convs)
# ----------------------------------------------------------------------------
def fcomb_reference(feature_map, z, params):
    B, C, H, W = feature_map.shape
    L = z.shape[1]
    zt = jnp.broadcast_to(z[:, :, None, None], (B, L, H, W))       # == tf.tile behavior
    x = jnp.concatenate([feature_map, zt], axis=1)                 # channel concat (NCHW)
    x = jnp.transpose(x, (0, 2, 3, 1))                             # NHWC
    w1 = jnp.concatenate([params["w1f"], params["w1z"]], axis=0)
    hp = jax.lax.Precision.HIGHEST
    h = jnp.maximum(jnp.einsum("bhwc,cf->bhwf", x, w1, precision=hp) + params["b1"], 0.0)
    for k in range(params["n_mid"]):
        h = jnp.maximum(
            jnp.einsum("bhwf,fg->bhwg", h, params["w_mid"][k], precision=hp)
            + params["b_mid"][k], 0.0)
    out = jnp.einsum("bhwf,fn->bhwn", h, params["w_last"], precision=hp) + params["b_last"]
    return jnp.transpose(out, (0, 3, 1, 2))                        # back to NCHW


# ----------------------------------------------------------------------------
if __name__ == "__main__":
    key = jax.random.PRNGKey(0)

    # Small shapes consistent with the module: feature_map has num_filters[0] channels.
    B, H, W = 2, 16, 16
    num_filters = [32, 64, 128, 192]      # only num_filters[0] is used by Fcomb
    latent_dim = 6
    num_classes = 2
    no_convs_fcomb = 4

    k_fm, k_z, k_par = jax.random.split(key, 3)
    feature_map = jax.random.normal(k_fm, (B, num_filters[0], H, W), jnp.float32)  # UNet output (NCHW)
    z = jax.random.normal(k_z, (B, latent_dim), jnp.float32)                       # latent sample

    params, _ = make_fcomb_params(k_par, num_filters, latent_dim, num_classes, no_convs_fcomb)

    out = fcomb_forward(feature_map, z, params, num_classes)
    out = jax.block_until_ready(out)
    assert out.shape == (B, num_classes, H, W)

    ref = fcomb_reference(feature_map, z, params)
    max_err = float(jnp.max(jnp.abs(out - ref)))
    assert max_err < 1e-1, f"max abs error vs reference: {max_err}"

    print("KERNEL_OK")
</pallas_src>

<mosaic_0001>
module attributes {stable_mosaic.version = 11 : i64} {
  func.func @fcomb_kernel(%arg0: i32, %arg1: i32, %arg2: memref<1x32x128xf32, #tpu.memory_space<vmem>>, %arg3: memref<1x32x1xf32, #tpu.memory_space<vmem>>, %arg4: memref<32x32xbf16, #tpu.memory_space<vmem>>, %arg5: memref<2x32x32xbf16, #tpu.memory_space<vmem>>, %arg6: memref<2x32x1xf32, #tpu.memory_space<vmem>>, %arg7: memref<2x32xbf16, #tpu.memory_space<vmem>>, %arg8: memref<2x1xf32, #tpu.memory_space<vmem>>, %arg9: memref<1x2x128xf32, #tpu.memory_space<vmem>>) attributes {dimension_semantics = [#tpu.dimension_semantics<parallel>, #tpu.dimension_semantics<parallel>], iteration_bounds = array<i64: 2, 2>, scalar_prefetch = 0 : i64, scratch_operands = 0 : i64, tpu.core_type = #tpu.core_type<tc>, window_params = [{transform_indices = @transform_0, window_bounds = array<i64: 1, 32, 128>}, {transform_indices = @transform_1, window_bounds = array<i64: 1, 32, 1>}, {pipeline_mode = #tpu.pipeline_mode<synchronous>, transform_indices = @transform_2, window_bounds = array<i64: 32, 32>}, {pipeline_mode = #tpu.pipeline_mode<synchronous>, transform_indices = @transform_3, window_bounds = array<i64: 2, 32, 32>}, {pipeline_mode = #tpu.pipeline_mode<synchronous>, transform_indices = @transform_4, window_bounds = array<i64: 2, 32, 1>}, {pipeline_mode = #tpu.pipeline_mode<synchronous>, transform_indices = @transform_5, window_bounds = array<i64: 2, 32>}, {pipeline_mode = #tpu.pipeline_mode<synchronous>, transform_indices = @transform_6, window_bounds = array<i64: 2, 1>}, {transform_indices = @transform_7, window_bounds = array<i64: 1, 2, 128>}]} {
    %c0 = arith.constant 0 : index
    %c0_0 = arith.constant 0 : index
    %c0_1 = arith.constant 0 : index
    %0 = vector.load %arg2[%c0, %c0_0, %c0_1] : memref<1x32x128xf32, #tpu.memory_space<vmem>>, vector<1x32x128xf32>
    %1 = vector.shape_cast %0 : vector<1x32x128xf32> to vector<32x128xf32>
    %2 = arith.truncf %1 : vector<32x128xf32> to vector<32x128xbf16>
    %c0_2 = arith.constant 0 : index
    %c0_3 = arith.constant 0 : index
    %3 = vector.load %arg4[%c0_2, %c0_3] : memref<32x32xbf16, #tpu.memory_space<vmem>>, vector<32x32xbf16>
    %cst = arith.constant dense<0.000000e+00> : vector<32x128xf32>
    %4 = tpu.matmul %3, %2, %cst {dimension_numbers = #tpu.dot_dimension_numbers<[1], [0], [0], [1], [0, 0, 1, 1], [], []>} : vector<32x32xbf16>, vector<32x128xbf16>, vector<32x128xf32> -> vector<32x128xf32>
    %c0_4 = arith.constant 0 : index
    %c0_5 = arith.constant 0 : index
    %c0_6 = arith.constant 0 : index
    %5 = vector.load %arg3[%c0_4, %c0_5, %c0_6] : memref<1x32x1xf32, #tpu.memory_space<vmem>>, vector<1x32x1xf32>
    %6 = vector.shape_cast %5 : vector<1x32x1xf32> to vector<32x1xf32>
    %7 = vector.broadcast %6 : vector<32x1xf32> to vector<32x128xf32>
    %8 = arith.addf %4, %7 : vector<32x128xf32>
    %cst_7 = arith.constant 0.000000e+00 : f32
    %9 = vector.broadcast %cst_7 : f32 to vector<32x128xf32>
    %10 = arith.maximumf %8, %9 : vector<32x128xf32>
    %c0_8 = arith.constant 0 : index
    %c0_9 = arith.constant 0 : index
    %c0_10 = arith.constant 0 : index
    %11 = vector.load %arg5[%c0_8, %c0_9, %c0_10] : memref<2x32x32xbf16, #tpu.memory_space<vmem>>, vector<1x32x32xbf16>
    %12 = vector.shape_cast %11 : vector<1x32x32xbf16> to vector<32x32xbf16>
    %13 = arith.truncf %10 : vector<32x128xf32> to vector<32x128xbf16>
    %cst_11 = arith.constant dense<0.000000e+00> : vector<32x128xf32>
    %14 = tpu.matmul %12, %13, %cst_11 {dimension_numbers = #tpu.dot_dimension_numbers<[1], [0], [0], [1], [0, 0, 1, 1], [], []>} : vector<32x32xbf16>, vector<32x128xbf16>, vector<32x128xf32> -> vector<32x128xf32>
    %c0_12 = arith.constant 0 : index
    %c0_13 = arith.constant 0 : index
    %c0_14 = arith.constant 0 : index
    %15 = vector.load %arg6[%c0_12, %c0_13, %c0_14] : memref<2x32x1xf32, #tpu.memory_space<vmem>>, vector<1x32x1xf32>
    %16 = vector.shape_cast %15 : vector<1x32x1xf32> to vector<32x1xf32>
    %17 = vector.broadcast %16 : vector<32x1xf32> to vector<32x128xf32>
    %18 = arith.addf %14, %17 : vector<32x128xf32>
    %cst_15 = arith.constant 0.000000e+00 : f32
    %19 = vector.broadcast %cst_15 : f32 to vector<32x128xf32>
    %20 = arith.maximumf %18, %19 : vector<32x128xf32>
    %c1 = arith.constant 1 : index
    %c0_16 = arith.constant 0 : index
    %c0_17 = arith.constant 0 : index
    %21 = vector.load %arg5[%c1, %c0_16, %c0_17] : memref<2x32x32xbf16, #tpu.memory_space<vmem>>, vector<1x32x32xbf16>
    %22 = vector.shape_cast %21 : vector<1x32x32xbf16> to vector<32x32xbf16>
    %23 = arith.truncf %20 : vector<32x128xf32> to vector<32x128xbf16>
    %cst_18 = arith.constant dense<0.000000e+00> : vector<32x128xf32>
    %24 = tpu.matmul %22, %23, %cst_18 {dimension_numbers = #tpu.dot_dimension_numbers<[1], [0], [0], [1], [0, 0, 1, 1], [], []>} : vector<32x32xbf16>, vector<32x128xbf16>, vector<32x128xf32> -> vector<32x128xf32>
    %c1_19 = arith.constant 1 : index
    %c0_20 = arith.constant 0 : index
    %c0_21 = arith.constant 0 : index
    %25 = vector.load %arg6[%c1_19, %c0_20, %c0_21] : memref<2x32x1xf32, #tpu.memory_space<vmem>>, vector<1x32x1xf32>
    %26 = vector.shape_cast %25 : vector<1x32x1xf32> to vector<32x1xf32>
    %27 = vector.broadcast %26 : vector<32x1xf32> to vector<32x128xf32>
    %28 = arith.addf %24, %27 : vector<32x128xf32>
    %cst_22 = arith.constant 0.000000e+00 : f32
    %29 = vector.broadcast %cst_22 : f32 to vector<32x128xf32>
    %30 = arith.maximumf %28, %29 : vector<32x128xf32>
    %c0_23 = arith.constant 0 : index
    %c0_24 = arith.constant 0 : index
    %31 = vector.load %arg7[%c0_23, %c0_24] : memref<2x32xbf16, #tpu.memory_space<vmem>>, vector<2x32xbf16>
    %32 = arith.truncf %30 : vector<32x128xf32> to vector<32x128xbf16>
    %cst_25 = arith.constant dense<0.000000e+00> : vector<2x128xf32>
    %33 = tpu.matmul %31, %32, %cst_25 {dimension_numbers = #tpu.dot_dimension_numbers<[1], [0], [0], [1], [0, 0, 1, 1], [], []>} : vector<2x32xbf16>, vector<32x128xbf16>, vector<2x128xf32> -> vector<2x128xf32>
    %c0_26 = arith.constant 0 : index
    %c0_27 = arith.constant 0 : index
    %34 = vector.load %arg8[%c0_26, %c0_27] : memref<2x1xf32, #tpu.memory_space<vmem>>, vector<2x1xf32>
    %35 = vector.broadcast %34 : vector<2x1xf32> to vector<2x128xf32>
    %36 = arith.addf %33, %35 : vector<2x128xf32>
    %c0_28 = arith.constant 0 : index
    %c0_29 = arith.constant 0 : index
    %c0_30 = arith.constant 0 : index
    %37 = vector.load %arg9[%c0_28, %c0_29, %c0_30] : memref<1x2x128xf32, #tpu.memory_space<vmem>>, vector<1x2x128xf32>
    %38 = vector.shape_cast %37 : vector<1x2x128xf32> to vector<2x128xf32>
    %39 = vector.shape_cast %36 : vector<2x128xf32> to vector<1x2x128xf32>
    tpu.vector_store %arg9[%c0_28, %c0_29, %c0_30], %39 {strides = array<i32>} : memref<1x2x128xf32, #tpu.memory_space<vmem>>, vector<1x2x128xf32>,
    return
  }
  func.func @transform_0(%arg0: i32, %arg1: i32) -> (i32, i32, i32) {
    %c0_i32 = arith.constant 0 : i32
    %c0_i32_0 = arith.constant 0 : i32
    return %arg0, %c0_i32, %arg1 : i32, i32, i32
  }
  func.func @transform_1(%arg0: i32, %arg1: i32) -> (i32, i32, i32) {
    %c0_i32 = arith.constant 0 : i32
    %c0_i32_0 = arith.constant 0 : i32
    %c0_i32_1 = arith.constant 0 : i32
    return %arg0, %c0_i32, %c0_i32_0 : i32, i32, i32
  }
  func.func @transform_2(%arg0: i32, %arg1: i32) -> (i32, i32) {
    %c0_i32 = arith.constant 0 : i32
    %c0_i32_0 = arith.constant 0 : i32
    %c0_i32_1 = arith.constant 0 : i32
    return %c0_i32, %c0_i32_0 : i32, i32
  }
  func.func @transform_3(%arg0: i32, %arg1: i32) -> (i32, i32, i32) {
    %c0_i32 = arith.constant 0 : i32
    %c0_i32_0 = arith.constant 0 : i32
    %c0_i32_1 = arith.constant 0 : i32
    %c0_i32_2 = arith.constant 0 : i32
    return %c0_i32, %c0_i32_0, %c0_i32_1 : i32, i32, i32
  }
  func.func @transform_4(%arg0: i32, %arg1: i32) -> (i32, i32, i32) {
    %c0_i32 = arith.constant 0 : i32
    %c0_i32_0 = arith.constant 0 : i32
    %c0_i32_1 = arith.constant 0 : i32
    %c0_i32_2 = arith.constant 0 : i32
    return %c0_i32, %c0_i32_0, %c0_i32_1 : i32, i32, i32
  }
  func.func @transform_5(%arg0: i32, %arg1: i32) -> (i32, i32) {
    %c0_i32 = arith.constant 0 : i32
    %c0_i32_0 = arith.constant 0 : i32
    %c0_i32_1 = arith.constant 0 : i32
    return %c0_i32, %c0_i32_0 : i32, i32
  }
  func.func @transform_6(%arg0: i32, %arg1: i32) -> (i32, i32) {
    %c0_i32 = arith.constant 0 : i32
    %c0_i32_0 = arith.constant 0 : i32
    %c0_i32_1 = arith.constant 0 : i32
    return %c0_i32, %c0_i32_0 : i32, i32
  }
  func.func @transform_7(%arg0: i32, %arg1: i32) -> (i32, i32, i32) {
    %c0_i32 = arith.constant 0 : i32
    %c0_i32_0 = arith.constant 0 : i32
    return %arg0, %c0_i32, %arg1 : i32, i32, i32
  }
}

</mosaic_0001>

<bundles_post_ra>
// kernel: tpu_custom_call.1
= control target key start
LH: loop header
LB: loop body
LE: loop exit
PB: predicated region body
PF: predicated region fallthrough
CT: control target
= control target key end

     0   :  { %12 = vsyncpa [#allocation4], 0  ;;  %s1343_s0 = inlined_call_operand.vmem [shape: f32[2,32,256], index: 0, kind: input, shape index: {}]   ;;  %s1344_s1 = inlined_call_operand.vmem [shape: f32[2,32,1], index: 1, kind: input, shape index: {}]   ;;  %s1345_s2 = inlined_call_operand.hbm [shape: bf16[32,32], index: 2, kind: input, shape index: {}]   ;;  %s1346_s3 = inlined_call_operand.hbm [shape: bf16[2,32,32], index: 3, kind: input, shape index: {}]   ;;  %s1347_s4 = inlined_call_operand.vmem [shape: f32[2,32,1], index: 4, kind: input, shape index: {}]   ;;  %s1348_s5 = inlined_call_operand.vmem [shape: bf16[2,32], index: 5, kind: input, shape index: {}]   ;;  %s1349_s6 = inlined_call_operand.vmem [shape: f32[2,1], index: 6, kind: input, shape index: {}]   ;;  %s1350_s7 = inlined_call_operand.hbm [shape: f32[2,2,256], index: 7, kind: output, shape index: {}]  }
   0x1   :  { %13 = vsyncpa [#allocation7], 0 }
   0x2   :  { %14 = vsyncpa [#allocation5], 0 }
   0x3   :  { %16 = vsyncpa [#allocation5 + $0x1], 0  ;;  %s1139_s24 = smov 0   ;;  %s1141_s25 = smov 0  }
   0x4   :  { %s1143_s26 = smov 0   ;;  %s1145_s27 = smov 0  }
   0x5   :  { %s1147_s28 = smov 0   ;;  %s1149_s29 = smov 0  }
   0x6   :  { %s1151_s30 = smov 0   ;;  %s1153_s8 = smov 0  }
   0x7 LB: > { %1355 = sst [smem:[#allocation12_spill]] %s1064_s24  ;;  %s769_s9 = sadd.s32 4294967295, %s1092_s8   ;;  %s1092_s8 = sphi %s1153_s8, %s22_s8   ;;  %s1088_s30 = sphi %s1151_s30, %s1376_s30   ;;  %s1084_s29 = sphi %s1149_s29, %s1375_s29   ;;  %s1080_s28 = sphi %s1147_s28, %s1374_s28   ;;  %s1076_s27 = sphi %s1145_s27, %s1373_s27   ;;  %s1072_s26 = sphi %s1143_s26, %s1372_s26   ;;  %s1068_s25 = sphi %s1141_s25, %s1371_s25   ;;  %s1064_s24 = sphi %s1139_s24, %s1370_s24  }
   0x8   : > { %s770_s10 = sadd.s32 4294967294, %s1092_s8   ;;  %s31_s11 = sadd.s32 1, %s1084_s29 }
   0x9   : > { %s34_s12 = sadd.s32 1, %s1088_s30  ;;  %p32_p0 = scmp.ge.s32.totalorder %s31_s11, 2 }
   0xa   : > { %s43_s13 = sadd.s32 1, %s1072_s26  ;;  %p50_p1 = scmp.ne.s32.totalorder %s1072_s26, %s1068_s25 }
   0xb   : > { %p51_p2 = scmp.eq.s32.totalorder %s1092_s8, 0  ;;  %s1378_s11 = smov (%p32_p0, %s31_s11), 0 }
   0xc   : > { %1356 = sst [smem:[#allocation13_spill]] %s1378_s11  ;;  %s1380_s12 = smov (!%p32_p0, %s34_s12), %s1088_s30 }
   0xd   : > { %s39_s14 = ssub.s32 %s1084_s29, %s1378_s11  ;;  %p1192_p3 = por %p51_p2, %p50_p1 }
   0xe   : > { %p36_p4 = scmp.ge.s32.totalorder %s1380_s12, 2  ;;  %p213_p5 = scmp.eq.s32.totalorder %s769_s9, 3 }
   0xf   : > { %p218_p6 = scmp.ne.s32.totalorder %s1068_s25, %s1064_s24  ;;  %p219_p7 = scmp.eq.s32.totalorder %s770_s10, 3 }
  0x10   : > { %s1382_s12 = smov (%p36_p4, %s1380_s12), 0  ;;  %p1200_p8 = por %p213_p5, %p50_p1 }
  0x11   : > { %1358 = sst [smem:[#allocation14_spill]] %s1382_s12  ;;  %p1204_p9 = por %p219_p7, %p218_p6 }
  0x12   : > { %s38_s18 = ssub.s32 %s1088_s30, %s1382_s12  ;;  %p771_p10 = scmp.ge.s32.totalorder %s1092_s8, 1 }
  0x13   : > { %s1360_s17 = scalar_select %p1204_p9, 1, 0 }
  0x14   : > { %s40_s19 = sor.u32 %s39_s14, %s38_s18  ;;  %p226_p11 = scmp.lt.s32.totalorder %s1092_s8, 5 }
  0x15   : > { %1361 = sst [smem:[#allocation15_spill]] %s1360_s17  ;;  %p41_p12 = scmp.eq.s32.totalorder %s40_s19, 0 }
  0x16   : > { %p1212_p13 = pnand %p771_p10, %p226_p11  ;;  %p1216_p0 = scmp.eq.s32.totalorder %s769_s9, 0 }
  0x17   : > { %s1221_s22 = scalar_select %p41_p12, %s1072_s26, %s43_s13  }
  0x18   : > { %p842_p1 = pneg %p1212_p13  ;;  %s237_s14 = sshll.u32 %s1345_s2, 4  ;;  %s238_s14 = int_to_ptr.hbm [resolvable:$true] %s237_s14 }
  0x19   : > { %1364 = sst [smem:[#allocation16_spill]] %s1221_s22  ;;  %s1094_s18 = smov [#allocation3]  }
  0x1a   : > { %s239_s19 = sshll.u32 %s1094_s18, 4  ;;  %p843_p2 = pnand %p1216_p0, %p842_p1  ;;  %s240_s19 = int_to_ptr.vmem [resolvable:$true] %s239_s19 }
  0x1b   : > { %s1095_s12 = smov 64   ;;  %s1096_s9 = smov 4  }
  0x1c   : > { %845 = dma.hbm_to_vmem [thread:$0]  (!%p843_p2), %s238_s14, 256, %s240_s19, [#allocation4], %s1095_s12, %s1095_s12, %s1096_s9  }
  0x1d   : > { %s251_s13 = sshll.u32 %s1346_s3, 4  ;;  %s1097_s22 = smov [#allocation6]   ;;  %s252_s13 = int_to_ptr.hbm [resolvable:$true] %s251_s13 }
  0x1e   : > { %s253_s24 = sshll.u32 %s1097_s22, 4  ;;  %p774_p4 = scmp.ge.s32.totalorder %s1092_s8, 4  ;;  %s254_s24 = int_to_ptr.vmem [resolvable:$true] %s253_s24 }
  0x1f   : > { %848 = dma.hbm_to_vmem [thread:$0]  (!%p843_p2), %s252_s13, 512, %s254_s24, [#allocation7], %s1095_s12, %s1095_s12, %s1096_s9  }
  0x20   : > { %272 = sbr.rel (%p774_p4) target bundleno = 47 (0x2f), region = 36 }
  0x25   : > { %275 = sbr.rel (!%p1192_p3) target bundleno = 47 (0x2f), region = 40  ;;  %s277_s23 = sand.u32 (%p1192_p3), 1, %s1072_s26  }
  0x26   : > { %s776_s10 = sshll.u32 (%p1192_p3), %s1088_s30, 3  ;;  %s775_s14 = sshll.u32 (%p1192_p3), %s277_s23, 5 }
  0x27   : > { %s281_s18 = sadd.s32 (%p1192_p3), %s1084_s29, %s776_s10  ;;  %s279_s24 = scalar_lea.vmem (%p1192_p3), [#allocation2], %s775_s14 }
  0x28   : > { %s777_s11 = sshll.u32 (%p1192_p3), %s281_s18, 3 }
  0x29   : > { %s283_s22 = scalar_lea.vmem (%p1192_p3), %s1343_s0, %s777_s11 }
  0x2a   : > { %v318_v0 = vld [vmem:[%s283_s22] sm:$0xff]  ;;  %v320_v1 = vld [vmem:[%s283_s22 + $0x10] sm:$0xff] }
  0x2b   : > { %v322_v2 = vld [vmem:[%s283_s22 + $0x20] sm:$0xff]  ;;  %319 = vst [vmem:[%s279_s24] sm:$0xff] %v318_v0  ;;  %v324_v3 = vld [vmem:[%s283_s22 + $0x30] sm:$0xff] }
  0x2c   : > { %321 = vst [vmem:[%s279_s24 + $0x8] sm:$0xff] %v320_v1 }
  0x2d   : > { %323 = vst [vmem:[%s279_s24 + $0x10] sm:$0xff] %v322_v2 }
  0x2e   : > { %325 = vst [vmem:[%s279_s24 + $0x18] sm:$0xff] %v324_v3 }
  0x2f PF: > { %342 = sbr.rel (%p1212_p13) target bundleno = 701 (0x2bd), region = 82  ;;  %s1245_s12 = sand.u32 (!%p1212_p13), 1, %s1068_s25  }
  0x30   : > { %s779_s15 = sshll.u32 (!%p1212_p13), %s1245_s12, 5 }
  0x31   : > { %s347_s9 = scalar_lea.vmem (!%p1212_p13), [#allocation2], %s779_s15 }
  0x34   : > { %1051 = dma.done.wait (%p1216_p0), [#allocation4], 256  }
  0x35   : > { %1053 = vsyncadd (%p1216_p0), [#allocation4], 4294967040 }
  0x36   : > { %1055 = dma.done.wait (%p1216_p0), [#allocation7], 512  }
  0x37   : > { %1057 = vsyncadd (%p1216_p0), [#allocation7], 4294966784  ;;  %p391_p3 = scmp.lt.s32.totalorder %s1080_s28, 1  ;;  %v1098_v4 = vmov 0   ;;  %v399_v5 = vld [vmem:[%s347_s9 + $0x10] sm:$0xff]  ;;  %v400_v6 = vld [vmem:[%s347_s9 + $0x18] sm:$0xff] }
  0x38   : > { %927 = vset.pattern.permute.xlu0 %v1098_v4  ;;  %928 = vset.pattern.permute.xlu1 %v1098_v4  ;;  %v402_v8 = vpack.c.bf16 %v400_v6, %v399_v5  ;;  %v397_v9 = vld [vmem:[%s347_s9] sm:$0xff]  ;;  %v398_v10 = vld [vmem:[%s347_s9 + $0x8] sm:$0xff]  ;;  %vm441_vm0 = vcmask 261120   ;;  %v808_v19 = vld [vmem:[%s1347_s4 + $0x38] sm:$0xff]  ;;  %s821_s24 = sshll.u32 %s1080_s28, 1  ;;  %s638_s11 = scalar_lea.sflag [#allocation5], %s1245_s12 }
  0x39   : > { %s392_s20 = scalar_select %p391_p3, %s1080_s28, 1  ;;  %929 = vset.pattern.permute.xlu2 %v1098_v4  ;;  %v401_v12 = vpack.c.bf16 %v398_v10, %v397_v9  ;;  %v826_v13 = vld [vmem:[#allocation3] sm:$0xff]  ;;  %v478_v17 = vld [vmem:[%s1347_s4 + $0x8] sm:$0xff]  ;;  %v479_v27 = vld [vmem:[%s1347_s4 + $0x10] sm:$0xff] }
  0x3a   : > { %454 = vmatpush.bf16.msra.mxu0 %v402_v8  ;;  %v477_v16 = vld [vmem:[%s1347_s4] sm:$0xff]  ;;  %v827_v18 = vld [vmem:[#allocation3 + $0x8] sm:$0xff]  ;;  %493 = vperm.xlu2 %929, %v479_v27   ;;  %v480_v37 = vld [vmem:[%s1347_s4 + $0x18] sm:$0xff]  ;;  %s648_s15 = sadd.s32 %s1076_s27, %s821_s24  ;;  %s1010_s22 = scalar_lea.hbm %s1350_s7, 8 }
  0x3b   : > { %s825_s13 = sshll.u32 %s392_s20, 5  ;;  %v805_v20 = vld [vmem:[%s1347_s4 + $0x20] sm:$0xff]  ;;  %v828_v42 = vld [vmem:[#allocation6] sm:$0xff]  ;;  %v806_v44 = vld [vmem:[%s1347_s4 + $0x28] sm:$0xff]  ;;  %s822_s9 = sshll.u32 %s648_s15, 1 }
  0x3c   : > { %s395_s14 = scalar_lea.vmem %s1344_s1, %s825_s13  ;;  %v614_v21 = vld [vmem:[%s1349_s6] sm:$0x3]  ;;  %v807_v43 = vld [vmem:[%s1347_s4 + $0x30] sm:$0xff]  ;;  %v829_v45 = vld [vmem:[#allocation6 + $0x8] sm:$0xff]  ;;  %s782_s20 = sshll.u32 %s1245_s12, 1 }
  0x3d   : > { %v409_v7 = vld [vmem:[%s395_s14 + $0x10] sm:$0xff]  ;;  %v407_v11 = vld [vmem:[%s395_s14] sm:$0xff]  ;;  %v410_v14 = vld [vmem:[%s395_s14 + $0x18] sm:$0xff]  ;;  %s650_s10 = scalar_lea.hbm %s1350_s7, %s822_s9 }
  0x3e   : > { %423 = vperm.xlu0 %927, %v409_v7   ;;  %413 = vperm.xlu1 %928, %v407_v11   ;;  %v408_v15 = vld [vmem:[%s395_s14 + $0x8] sm:$0xff]  ;;  %v830_v0 = vld [vmem:[#allocation6 + $0x10] sm:$0xff]  ;;  %s390_s14 = scalar_lea.vmem [#allocation8], %s782_s20  ;;  %s654_s18 = sshll.u32 %s650_s10, 4  ;;  %s655_s18 = int_to_ptr.hbm [resolvable:$true] %s654_s18 }
  0x3f   : > { %455 = vmatpush.bf16.msra.mxu0 %v401_v12  ;;  %v831_v1 = vld [vmem:[#allocation6 + $0x18] sm:$0xff]  ;;  %s652_s21 = sshll.u32 %s390_s14, 4  ;;  %s1004_s17 = sshra.s32 %s655_s18, 4  ;;  %s653_s21 = int_to_ptr.vmem [resolvable:$true] %s652_s21  ;;  %s1005_s17 = int_to_ptr.hbm [resolvable:$true] %s1004_s17 }
  0x40   : > { %s1006_s27 = scalar_lea.hbm %s1005_s17, 2  ;;  %p1011_p10 = scmp.lt.s32.totalorder %s1005_s17, %s1350_s7 }
  0x41   : > { %p1007_p5 = scmp.ne.s32.totalorder %s1005_s17, %s1006_s27  ;;  %p1012_p11 = scmp.lt.s32.totalorder %s1010_s22, %s1006_s27 }
  0x42   : > { %793 = vmatmul.msk.bf16.vlgmr.msra.gmra.mxu0 %vm441_vm0, %v826_v13  ;;  %498 = vperm.xlu2 %929, %v480_v37  }
  0x43   : > { %p1008_p6 = pnand %p1007_p5, %p1200_p8  ;;  %p1013_p12 = por %p1012_p11, %p1011_p10 }
  0x45   : > { %p1009_p7 = pneg %p1008_p6 }
  0x46   : > { %428 = vperm.xlu0 %927, %v410_v14   ;;  %418 = vperm.xlu1 %928, %v408_v15  }
  0x47   : > { %p1014_p13 = pnand %p1013_p12, %p1009_p7 }
  0x4a   : > { %564 = vperm.xlu2 %929, %v807_v43  }
  0x4e   : > { %483 = vperm.xlu0 %927, %v477_v16   ;;  %488 = vperm.xlu1 %928, %v478_v17  }
  0x52   : > { %794 = vmatmul.msk.bf16.gmra.mxu0 %vm441_vm0, %v827_v18  ;;  %559 = vperm.xlu2 %929, %v806_v44  }
  0x56   : > { %569 = vperm.xlu0 %927, %v808_v19   ;;  %554 = vperm.xlu1 %928, %v805_v20   ;;  %v611_v20 = vld [vmem:[%s1348_s5] sm:$0x1] }
  0x5e   : > { %617 = vperm.xlu0 %927, %v614_v21  }
  0x94   : > { %v494_v48 = vpop.permute.xlu2 %493 }
  0x9c   : > { %v499_v52 = vpop.permute.xlu2 %498 }
  0xa4   : > { %v565_v4 = vpop.permute.xlu2 %564 }
  0xac   : > { %v560_v8 = vpop.permute.xlu2 %559 }
  0xb0   : > { %v424_v24 = vpop.permute.xlu0 %423  ;;  %v414_v25 = vpop.permute.xlu1 %413 }
  0xb8   : > { %v429_v28 = vpop.permute.xlu0 %428  ;;  %v419_v30 = vpop.permute.xlu1 %418 }
  0xbf   : > { %v457_v22 = vpop.f32.mrf.mxu0 }
  0xc0   : > { %v458_v34 = vadd.f32 %v457_v22, %v414_v25  ;;  %v489_v50 = vpop.permute.xlu1 %488  ;;  %v484_v56 = vpop.permute.xlu0 %483 }
  0xc2   : > { %v467_v40 = vmax.f32 %v458_v34, 0.0 }
  0xc7   : > { %v459_v23 = vpop.f32.mrf.mxu0 }
  0xc8   : > { %v460_v32 = vadd.f32 %v459_v23, %v419_v30  ;;  %v570_v6 = vpop.permute.xlu0 %569  ;;  %v555_v12 = vpop.permute.xlu1 %554 }
  0xca   : > { %v468_v38 = vmax.f32 %v460_v32, 0.0 }
  0xcc   : > { %v475_v41 = vpack.c.bf16 %v468_v38, %v467_v40 }
  0xcf   : > { %v462_v26 = vpop.f32.mrf.mxu0 }
  0xd0   : > { %v463_v29 = vadd.f32 %v462_v26, %v424_v24  ;;  %v618_v21 = vpop.permute.xlu0 %617 }
  0xd2   : > { %v469_v35 = vmax.f32 %v463_v29, 0.0 }
  0xd7   : > { %v464_v31 = vpop.f32.mrf.mxu0 }
  0xd8   : > { %v465_v33 = vadd.f32 %v464_v31, %v429_v28 }
  0xda   : > { %v470_v36 = vmax.f32 %v465_v33, 0.0 }
  0xdc   : > { %v476_v39 = vpack.c.bf16 %v470_v36, %v469_v35 }
  0xde   : > { %523 = vmatpush.bf16.msra.mxu1 %v476_v39 }
  0xe2   : > { %524 = vmatpush.bf16.msra.mxu1 %v475_v41 }
  0xe5   : > { %803 = vmatmul.msk.bf16.vlgmr.msra.gmra.mxu1 %vm441_vm0, %v828_v42 }
  0xf5   : > { %804 = vmatmul.msk.bf16.gmra.mxu1 %vm441_vm0, %v829_v45 }
 0x162   : > { %v526_v46 = vpop.f32.mrf.mxu1 }
 0x163   : > { %v527_v57 = vadd.f32 %v526_v46, %v484_v56 }
 0x165   : > { %v536_v62 = vmax.f32 %v527_v57, 0.0 }
 0x16a   : > { %v528_v47 = vpop.f32.mrf.mxu1 }
 0x16b   : > { %v529_v54 = vadd.f32 %v528_v47, %v489_v50 }
 0x16d   : > { %v537_v60 = vmax.f32 %v529_v54, 0.0 }
 0x16f   : > { %v545_v63 = vpack.c.bf16 %v537_v60, %v536_v62 }
 0x172   : > { %v531_v49 = vpop.f32.mrf.mxu1 }
 0x173   : > { %v532_v51 = vadd.f32 %v531_v49, %v494_v48 }
 0x175   : > { %v538_v58 = vmax.f32 %v532_v51, 0.0 }
 0x17a   : > { %v533_v53 = vpop.f32.mrf.mxu1 }
 0x17b   : > { %v534_v55 = vadd.f32 %v533_v53, %v499_v52 }
 0x17d   : > { %v539_v59 = vmax.f32 %v534_v55, 0.0 }
 0x17f   : > { %v546_v61 = vpack.c.bf16 %v539_v59, %v538_v58 }
 0x181   : > { %594 = vmatpush.bf16.msra.mxu2 %v546_v61 }
 0x185   : > { %595 = vmatpush.bf16.msra.mxu2 %v545_v63 }
 0x188   : > { %817 = vmatmul.msk.bf16.vlgmr.msra.gmra.mxu2 %vm441_vm0, %v830_v0 }
 0x198   : > { %818 = vmatmul.msk.bf16.gmra.mxu2 %vm441_vm0, %v831_v1 }
 0x20b   : > { %v597_v2 = vpop.f32.mrf.mxu2 }
 0x20c   : > { %v598_v13 = vadd.f32 %v597_v2, %v555_v12 }
 0x20e   : > { %v607_v18 = vmax.f32 %v598_v13, 0.0 }
 0x213   : > { %v599_v3 = vpop.f32.mrf.mxu2 }
 0x214   : > { %v600_v10 = vadd.f32 %v599_v3, %v560_v8 }
 0x216   : > { %v608_v16 = vmax.f32 %v600_v10, 0.0 }
 0x218   : > { %v612_v19 = vpack.c.bf16 %v608_v16, %v607_v18 }
 0x21b   : > { %v602_v5 = vpop.f32.mrf.mxu2 }
 0x21c   : > { %v603_v7 = vadd.f32 %v602_v5, %v565_v4 }
 0x21e   : > { %v609_v14 = vmax.f32 %v603_v7, 0.0 }
 0x223   : > { %v604_v9 = vpop.f32.mrf.mxu2 }
 0x224   : > { %v605_v11 = vadd.f32 %v604_v9, %v570_v6 }
 0x226   : > { %v610_v15 = vmax.f32 %v605_v11, 0.0 }
 0x228   : > { %v613_v17 = vpack.c.bf16 %v610_v15, %v609_v14 }
 0x22a   : > { %629 = vmatpush.bf16.msra.mxu3 %v613_v17 }
 0x22e   : > { %630 = vmatpush.bf16.msra.mxu3 %v612_v19 }
 0x231   : > { %819 = vmatmul.msk.bf16.vlgmr.msra.gmra.mxu3 %vm441_vm0, %v611_v20 }
 0x2b4   : > { %v632_v22 = vpop.f32.mrf.mxu3 }
 0x2b5   : > { %v633_v23 = vadd.f32 %v632_v22, %v618_v21 }
 0x2b7   : > { %636 = vst [vmem:[%s390_s14] sm:$0x3] %v633_v23 }
 0x2b8   : > { %1017 = shalt.err (!%p1014_p13)
}
 0x2b9   : > { %840 = dma.vmem_to_hbm [thread:$0]  (%p1200_p8), %s653_s21, 32, %s655_s18, %s638_s11  }
 0x2bc   : > { %v634_v24 = vpop.f32.mrf.mxu3 }
 0x2bd PF: > { %s1365_s12 = sld [smem:[#allocation12_spill]]  ;;  %p857_p0 = scmp.ge.s32.totalorder %s1092_s8, 2 }
 0x2bf   : > { %p850_p1 = pnand %p857_p0, %p1204_p9 }
 0x2c1   : > { %p851_p2 = pneg %p850_p1 }
 0x2c3   : > { %s666_s20 = sand.u32 1, %s1365_s12  }
 0x2c4   : > { %s667_s13 = scalar_lea.sflag [#allocation5], %s666_s20 }
 0x2c5   : > { %1059 = dma.done.wait (%p851_p2), %s667_s13, 32  }
 0x2c6   : > { %1061 = vsyncadd (%p851_p2), %s667_s13, 4294967264  ;;  %s22_s8 = sadd.s32 1, %s1092_s8   ;;  %s1367_s16 = sld [smem:[#allocation16_spill]] }
 0x2c7   : > { %p19_p4 = scmp.ge.s32.totalorder %s22_s8, 6   ;;  %s1368_s23 = sld [smem:[#allocation13_spill]] }
 0x2c8   : > { %s1369_s10 = sld [smem:[#allocation14_spill]]  ;;  %s1370_s24 = smov %s1068_s25 }
 0x2c9   : > { %s1371_s25 = smov %s1072_s26  ;;  %s1373_s27 = smov %s1084_s29 }
 0x2ca   : > { %s1374_s28 = smov %s1088_s30  ;;  %21 = sbr.rel (!%p19_p4) target bundleno = 7 (0x7), region = 140 }
 0x2cc   : > { %s1372_s26 = smov %s1367_s16 }
 0x2cd   : > { %s1375_s29 = smov %s1368_s23 }
 0x2ce   : > { %s1376_s30 = smov %s1369_s10 }
 0x2cf   :  { %673 = vsyncpa [#allocation4], 1 }
 0x2d0   :  { %675 = vsyncpa [#allocation4 + $0x1], 1 }
 0x2d1   :  { %676 = vsyncpa [#allocation7], 1 }
 0x2d2   :  { %677 = vsyncpa [#allocation5], 1 }
 0x2d3   :  { %679 = vsyncpa [#allocation5 + $0x1], 1 }

</bundles_post_ra>
